<compile_context>
chip_gen: v7x
topology: tpu7x:2x2x1
jax: 0.10.0
libtpu: 0.0.40
codegen_flags: <defaults>
</compile_context>

<pallas_src>
import jax
import jax.numpy as jnp
from jax.experimental import pallas as pl
from jax.experimental.pallas import tpu as pltpu

IN_DIM = 2
HIDDEN = 8
LANES = 128
SUBLANES = 8
LANE_BLOCK = SUBLANES * LANES          # 1024: minimum fully-packed batch block
DEFAULT_BLOCK_B = 256 * 1024           # ~2 MB x-tile + 1 MB out-tile per step


def simplenet_kernel(x_ref, w1_ref, b1_ref, w2_ref, b2_ref, o_ref):
    # x_ref: (2, rows, 128) VMEM, fully packed.  Weights/biases: SMEM scalars.
    x0 = x_ref[0]                              # (rows, 128) packed tile
    x1 = x_ref[1]                              # (rows, 128) packed tile
    # Fold b2 into one accumulator's init; two partial accumulators for ILP.
    acc_a = jnp.full_like(x0, b2_ref[0])
    acc_b = jnp.zeros_like(x0)
    # Fully unrolled over the 8 hidden units: pure VPU broadcast mul-add + ReLU.
    # The hidden activation h_j never touches VMEM.
    for j in range(HIDDEN):
        h_j = jnp.maximum(w1_ref[0, j] * x0 + w1_ref[1, j] * x1 + b1_ref[j], 0.0)
        if j % 2 == 0:
            acc_a = acc_a + w2_ref[j] * h_j
        else:
            acc_b = acc_b + w2_ref[j] * h_j
    z = acc_a + acc_b
    # Sigmoid: exp on the EUP slot; exact reciprocal (approx=True fails 1e-5).
    o_ref[...] = pl.reciprocal(1.0 + jnp.exp(-z), approx=False)


def _round_up(n, m):
    return ((n + m - 1) // m) * m


def simplenet_forward_fm(x_fm, w1, b1, w2, b2, *, block_b=None):
    """Fast path: x_fm is feature-major (2, B) float32.  Returns (B, 1).

    Keep activations feature-major upstream of this layer so no transpose or
    pad copy is needed (padding is skipped when B % block == 0).
    """
    x_fm = jnp.asarray(x_fm, jnp.float32)
    B = x_fm.shape[1]
    if block_b is None:
        block_b = DEFAULT_BLOCK_B

    # Per-step batch block: multiple of 1024 so every vreg is fully packed
    # (8 sublanes x 128 lanes) and block shapes satisfy the (8,128) rule.
    tb = min(_round_up(block_b, LANE_BLOCK), _round_up(B, LANE_BLOCK))
    Bp = _round_up(B, tb)

    if Bp == B:
        xp = x_fm                                        # no copy
    else:
        xp = jnp.zeros((IN_DIM, Bp), jnp.float32).at[:, :B].set(x_fm)
    xt = xp.reshape(IN_DIM, Bp // LANES, LANES)          # free metadata reshape

    rows_blk = tb // LANES                               # multiple of 8
    grid = (Bp // tb,)

    # Double-buffered x (2*tb f32) + out (tb f32) per step, plus slack.
    # Explicit limit avoids v5e's 16 MiB scoped default biting on large tiles;
    # stays well under v7x's 64 MiB physical VMEM.
    vmem_limit = int(min(64 << 20, max(16 << 20, 24 * tb + (2 << 20))))

    smem = pl.BlockSpec(memory_space=pltpu.MemorySpace.SMEM)
    out = pl.pallas_call(
        simplenet_kernel,
        out_shape=jax.ShapeDtypeStruct((Bp // LANES, LANES), jnp.float32),
        grid=grid,
        in_specs=[
            pl.BlockSpec((IN_DIM, rows_blk, LANES), lambda i: (0, i, 0)),  # x tile
            smem,   # w1 (2, 8)
            smem,   # b1 (8,)
            smem,   # w2 (8,)
            smem,   # b2 (1,)
        ],
        out_specs=pl.BlockSpec((rows_blk, LANES), lambda i: (i, 0)),
        compiler_params=pltpu.CompilerParams(
            dimension_semantics=("parallel",),   # batch axis shards across TCs (v7x)
            vmem_limit_bytes=vmem_limit,
        ),
    )(xt, w1, b1, w2, b2)

    return out.reshape(Bp)[:B][:, None]


def simplenet_forward(x, w1, b1, w2, b2, *, block_b=None):
    """Compatibility path: x is PyTorch-layout (B, 2).  Returns (B, 1).

    The transpose here is a wrapper-side copy; prefer simplenet_forward_fm
    with feature-major activations to avoid it.
    """
    return simplenet_forward_fm(jnp.asarray(x, jnp.float32).T, w1, b1, w2, b2,
                                block_b=block_b)


def init_params(key):
    # Weights are stored pre-transposed as (in, out):
    #   Linear(2, 8): w1 (2, 8), b1 (8,)
    #   Linear(8, 1): w2 (8,),   b2 (1,)
    # NOTE: real PyTorch nn.Linear stores (out, in); transpose when importing.
    k1, k2, k3, k4 = jax.random.split(key, 4)
    w1 = jax.random.normal(k1, (IN_DIM, HIDDEN), dtype=jnp.float32) * 0.5
    b1 = jax.random.normal(k2, (HIDDEN,), dtype=jnp.float32) * 0.1
    w2 = jax.random.normal(k3, (HIDDEN,), dtype=jnp.float32) * 0.5
    b2 = jax.random.normal(k4, (1,), dtype=jnp.float32) * 0.1
    return w1, b1, w2, b2


def reference_forward(x, w1, b1, w2, b2):
    h = jnp.maximum(x @ w1 + b1[None, :], 0.0)
    return jax.nn.sigmoid(h @ w2[:, None] + b2[None, :])


if __name__ == "__main__":
    key = jax.random.PRNGKey(0)
    kx1, kx2, kp = jax.random.split(key, 3)
    w1, b1, w2, b2 = init_params(kp)

    # Case 1: aligned batch, 4-step grid (exercises pipelining; >=2 steps so
    # both v7x TensorCores get work with the "parallel" batch axis).
    B1 = 4096
    x1 = jax.random.normal(kx1, (B1, IN_DIM), dtype=jnp.float32)
    out1 = jax.block_until_ready(simplenet_forward(x1, w1, b1, w2, b2, block_b=1024))
    ref1 = reference_forward(x1, w1, b1, w2, b2)
    assert out1.shape == (B1, 1)
    assert jnp.allclose(out1, ref1, atol=1e-5), "case 1: Pallas output mismatch"

    # Case 2: ragged small batch (padding path, single grid step).
    B2 = 100
    x2 = jax.random.normal(kx2, (B2, IN_DIM), dtype=jnp.float32)
    out2 = jax.block_until_ready(simplenet_forward(x2, w1, b1, w2, b2))
    ref2 = reference_forward(x2, w1, b1, w2, b2)
    assert out2.shape == (B2, 1)
    assert jnp.allclose(out2, ref2, atol=1e-5), "case 2: Pallas output mismatch"

    print("KERNEL_OK")
</pallas_src>

<mosaic_0001>
module attributes {stable_mosaic.version = 11 : i64} {
  func.func @simplenet_kernel(%arg0: i32, %arg1: memref<2x8x128xf32, #tpu.memory_space<vmem>>, %arg2: memref<2x8xf32, #tpu.memory_space<smem>>, %arg3: memref<8xf32, #tpu.memory_space<smem>>, %arg4: memref<8xf32, #tpu.memory_space<smem>>, %arg5: memref<1xf32, #tpu.memory_space<smem>>, %arg6: memref<8x128xf32, #tpu.memory_space<vmem>>) attributes {dimension_semantics = [#tpu.dimension_semantics<parallel>], iteration_bounds = array<i64: 4>, scalar_prefetch = 0 : i64, scratch_operands = 0 : i64, tpu.core_type = #tpu.core_type<tc>, window_params = [{transform_indices = @transform_0, window_bounds = array<i64: 2, 8, 128>}, {transform_indices = @transform_1, window_bounds = array<i64: 2, 8>}, {transform_indices = @transform_2, window_bounds = array<i64: 8>}, {transform_indices = @transform_3, window_bounds = array<i64: 8>}, {transform_indices = @transform_4, window_bounds = array<i64: 1>}, {transform_indices = @transform_5, window_bounds = array<i64: 8, 128>}]} {
    %c0 = arith.constant 0 : index
    %c0_0 = arith.constant 0 : index
    %c0_1 = arith.constant 0 : index
    %0 = vector.load %arg1[%c0, %c0_0, %c0_1] : memref<2x8x128xf32, #tpu.memory_space<vmem>>, vector<1x8x128xf32>
    %1 = vector.shape_cast %0 : vector<1x8x128xf32> to vector<8x128xf32>
    %c1 = arith.constant 1 : index
    %c0_2 = arith.constant 0 : index
    %c0_3 = arith.constant 0 : index
    %2 = vector.load %arg1[%c1, %c0_2, %c0_3] : memref<2x8x128xf32, #tpu.memory_space<vmem>>, vector<1x8x128xf32>
    %3 = vector.shape_cast %2 : vector<1x8x128xf32> to vector<8x128xf32>
    %c0_4 = arith.constant 0 : index
    %4 = memref.load %arg5[%c0_4] : memref<1xf32, #tpu.memory_space<smem>>
    %5 = vector.broadcast %4 : f32 to vector<8x128xf32>
    %cst = arith.constant 0.000000e+00 : f32
    %6 = vector.broadcast %cst : f32 to vector<8x128xf32>
    %c0_5 = arith.constant 0 : index
    %c0_6 = arith.constant 0 : index
    %7 = memref.load %arg2[%c0_5, %c0_6] : memref<2x8xf32, #tpu.memory_space<smem>>
    %8 = vector.broadcast %7 : f32 to vector<8x128xf32>
    %9 = arith.mulf %8, %1 : vector<8x128xf32>
    %c1_7 = arith.constant 1 : index
    %c0_8 = arith.constant 0 : index
    %10 = memref.load %arg2[%c1_7, %c0_8] : memref<2x8xf32, #tpu.memory_space<smem>>
    %11 = vector.broadcast %10 : f32 to vector<8x128xf32>
    %12 = arith.mulf %11, %3 : vector<8x128xf32>
    %13 = arith.addf %9, %12 : vector<8x128xf32>
    %c0_9 = arith.constant 0 : index
    %14 = memref.load %arg3[%c0_9] : memref<8xf32, #tpu.memory_space<smem>>
    %15 = vector.broadcast %14 : f32 to vector<8x128xf32>
    %16 = arith.addf %13, %15 : vector<8x128xf32>
    %cst_10 = arith.constant 0.000000e+00 : f32
    %17 = vector.broadcast %cst_10 : f32 to vector<8x128xf32>
    %18 = arith.maximumf %16, %17 : vector<8x128xf32>
    %c0_11 = arith.constant 0 : index
    %19 = memref.load %arg4[%c0_11] : memref<8xf32, #tpu.memory_space<smem>>
    %20 = vector.broadcast %19 : f32 to vector<8x128xf32>
    %21 = arith.mulf %20, %18 : vector<8x128xf32>
    %22 = arith.addf %5, %21 : vector<8x128xf32>
    %c0_12 = arith.constant 0 : index
    %c1_13 = arith.constant 1 : index
    %23 = memref.load %arg2[%c0_12, %c1_13] : memref<2x8xf32, #tpu.memory_space<smem>>
    %24 = vector.broadcast %23 : f32 to vector<8x128xf32>
    %25 = arith.mulf %24, %1 : vector<8x128xf32>
    %c1_14 = arith.constant 1 : index
    %c1_15 = arith.constant 1 : index
    %26 = memref.load %arg2[%c1_14, %c1_15] : memref<2x8xf32, #tpu.memory_space<smem>>
    %27 = vector.broadcast %26 : f32 to vector<8x128xf32>
    %28 = arith.mulf %27, %3 : vector<8x128xf32>
    %29 = arith.addf %25, %28 : vector<8x128xf32>
    %c1_16 = arith.constant 1 : index
    %30 = memref.load %arg3[%c1_16] : memref<8xf32, #tpu.memory_space<smem>>
    %31 = vector.broadcast %30 : f32 to vector<8x128xf32>
    %32 = arith.addf %29, %31 : vector<8x128xf32>
    %cst_17 = arith.constant 0.000000e+00 : f32
    %33 = vector.broadcast %cst_17 : f32 to vector<8x128xf32>
    %34 = arith.maximumf %32, %33 : vector<8x128xf32>
    %c1_18 = arith.constant 1 : index
    %35 = memref.load %arg4[%c1_18] : memref<8xf32, #tpu.memory_space<smem>>
    %36 = vector.broadcast %35 : f32 to vector<8x128xf32>
    %37 = arith.mulf %36, %34 : vector<8x128xf32>
    %38 = arith.addf %6, %37 : vector<8x128xf32>
    %c0_19 = arith.constant 0 : index
    %c2 = arith.constant 2 : index
    %39 = memref.load %arg2[%c0_19, %c2] : memref<2x8xf32, #tpu.memory_space<smem>>
    %40 = vector.broadcast %39 : f32 to vector<8x128xf32>
    %41 = arith.mulf %40, %1 : vector<8x128xf32>
    %c1_20 = arith.constant 1 : index
    %c2_21 = arith.constant 2 : index
    %42 = memref.load %arg2[%c1_20, %c2_21] : memref<2x8xf32, #tpu.memory_space<smem>>
    %43 = vector.broadcast %42 : f32 to vector<8x128xf32>
    %44 = arith.mulf %43, %3 : vector<8x128xf32>
    %45 = arith.addf %41, %44 : vector<8x128xf32>
    %c2_22 = arith.constant 2 : index
    %46 = memref.load %arg3[%c2_22] : memref<8xf32, #tpu.memory_space<smem>>
    %47 = vector.broadcast %46 : f32 to vector<8x128xf32>
    %48 = arith.addf %45, %47 : vector<8x128xf32>
    %cst_23 = arith.constant 0.000000e+00 : f32
    %49 = vector.broadcast %cst_23 : f32 to vector<8x128xf32>
    %50 = arith.maximumf %48, %49 : vector<8x128xf32>
    %c2_24 = arith.constant 2 : index
    %51 = memref.load %arg4[%c2_24] : memref<8xf32, #tpu.memory_space<smem>>
    %52 = vector.broadcast %51 : f32 to vector<8x128xf32>
    %53 = arith.mulf %52, %50 : vector<8x128xf32>
    %54 = arith.addf %22, %53 : vector<8x128xf32>
    %c0_25 = arith.constant 0 : index
    %c3 = arith.constant 3 : index
    %55 = memref.load %arg2[%c0_25, %c3] : memref<2x8xf32, #tpu.memory_space<smem>>
    %56 = vector.broadcast %55 : f32 to vector<8x128xf32>
    %57 = arith.mulf %56, %1 : vector<8x128xf32>
    %c1_26 = arith.constant 1 : index
    %c3_27 = arith.constant 3 : index
    %58 = memref.load %arg2[%c1_26, %c3_27] : memref<2x8xf32, #tpu.memory_space<smem>>
    %59 = vector.broadcast %58 : f32 to vector<8x128xf32>
    %60 = arith.mulf %59, %3 : vector<8x128xf32>
    %61 = arith.addf %57, %60 : vector<8x128xf32>
    %c3_28 = arith.constant 3 : index
    %62 = memref.load %arg3[%c3_28] : memref<8xf32, #tpu.memory_space<smem>>
    %63 = vector.broadcast %62 : f32 to vector<8x128xf32>
    %64 = arith.addf %61, %63 : vector<8x128xf32>
    %cst_29 = arith.constant 0.000000e+00 : f32
    %65 = vector.broadcast %cst_29 : f32 to vector<8x128xf32>
    %66 = arith.maximumf %64, %65 : vector<8x128xf32>
    %c3_30 = arith.constant 3 : index
    %67 = memref.load %arg4[%c3_30] : memref<8xf32, #tpu.memory_space<smem>>
    %68 = vector.broadcast %67 : f32 to vector<8x128xf32>
    %69 = arith.mulf %68, %66 : vector<8x128xf32>
    %70 = arith.addf %38, %69 : vector<8x128xf32>
    %c0_31 = arith.constant 0 : index
    %c4 = arith.constant 4 : index
    %71 = memref.load %arg2[%c0_31, %c4] : memref<2x8xf32, #tpu.memory_space<smem>>
    %72 = vector.broadcast %71 : f32 to vector<8x128xf32>
    %73 = arith.mulf %72, %1 : vector<8x128xf32>
    %c1_32 = arith.constant 1 : index
    %c4_33 = arith.constant 4 : index
    %74 = memref.load %arg2[%c1_32, %c4_33] : memref<2x8xf32, #tpu.memory_space<smem>>
    %75 = vector.broadcast %74 : f32 to vector<8x128xf32>
    %76 = arith.mulf %75, %3 : vector<8x128xf32>
    %77 = arith.addf %73, %76 : vector<8x128xf32>
    %c4_34 = arith.constant 4 : index
    %78 = memref.load %arg3[%c4_34] : memref<8xf32, #tpu.memory_space<smem>>
    %79 = vector.broadcast %78 : f32 to vector<8x128xf32>
    %80 = arith.addf %77, %79 : vector<8x128xf32>
    %cst_35 = arith.constant 0.000000e+00 : f32
    %81 = vector.broadcast %cst_35 : f32 to vector<8x128xf32>
    %82 = arith.maximumf %80, %81 : vector<8x128xf32>
    %c4_36 = arith.constant 4 : index
    %83 = memref.load %arg4[%c4_36] : memref<8xf32, #tpu.memory_space<smem>>
    %84 = vector.broadcast %83 : f32 to vector<8x128xf32>
    %85 = arith.mulf %84, %82 : vector<8x128xf32>
    %86 = arith.addf %54, %85 : vector<8x128xf32>
    %c0_37 = arith.constant 0 : index
    %c5 = arith.constant 5 : index
    %87 = memref.load %arg2[%c0_37, %c5] : memref<2x8xf32, #tpu.memory_space<smem>>
    %88 = vector.broadcast %87 : f32 to vector<8x128xf32>
    %89 = arith.mulf %88, %1 : vector<8x128xf32>
    %c1_38 = arith.constant 1 : index
    %c5_39 = arith.constant 5 : index
    %90 = memref.load %arg2[%c1_38, %c5_39] : memref<2x8xf32, #tpu.memory_space<smem>>
    %91 = vector.broadcast %90 : f32 to vector<8x128xf32>
    %92 = arith.mulf %91, %3 : vector<8x128xf32>
    %93 = arith.addf %89, %92 : vector<8x128xf32>
    %c5_40 = arith.constant 5 : index
    %94 = memref.load %arg3[%c5_40] : memref<8xf32, #tpu.memory_space<smem>>
    %95 = vector.broadcast %94 : f32 to vector<8x128xf32>
    %96 = arith.addf %93, %95 : vector<8x128xf32>
    %cst_41 = arith.constant 0.000000e+00 : f32
    %97 = vector.broadcast %cst_41 : f32 to vector<8x128xf32>
    %98 = arith.maximumf %96, %97 : vector<8x128xf32>
    %c5_42 = arith.constant 5 : index
    %99 = memref.load %arg4[%c5_42] : memref<8xf32, #tpu.memory_space<smem>>
    %100 = vector.broadcast %99 : f32 to vector<8x128xf32>
    %101 = arith.mulf %100, %98 : vector<8x128xf32>
    %102 = arith.addf %70, %101 : vector<8x128xf32>
    %c0_43 = arith.constant 0 : index
    %c6 = arith.constant 6 : index
    %103 = memref.load %arg2[%c0_43, %c6] : memref<2x8xf32, #tpu.memory_space<smem>>
    %104 = vector.broadcast %103 : f32 to vector<8x128xf32>
    %105 = arith.mulf %104, %1 : vector<8x128xf32>
    %c1_44 = arith.constant 1 : index
    %c6_45 = arith.constant 6 : index
    %106 = memref.load %arg2[%c1_44, %c6_45] : memref<2x8xf32, #tpu.memory_space<smem>>
    %107 = vector.broadcast %106 : f32 to vector<8x128xf32>
    %108 = arith.mulf %107, %3 : vector<8x128xf32>
    %109 = arith.addf %105, %108 : vector<8x128xf32>
    %c6_46 = arith.constant 6 : index
    %110 = memref.load %arg3[%c6_46] : memref<8xf32, #tpu.memory_space<smem>>
    %111 = vector.broadcast %110 : f32 to vector<8x128xf32>
    %112 = arith.addf %109, %111 : vector<8x128xf32>
    %cst_47 = arith.constant 0.000000e+00 : f32
    %113 = vector.broadcast %cst_47 : f32 to vector<8x128xf32>
    %114 = arith.maximumf %112, %113 : vector<8x128xf32>
    %c6_48 = arith.constant 6 : index
    %115 = memref.load %arg4[%c6_48] : memref<8xf32, #tpu.memory_space<smem>>
    %116 = vector.broadcast %115 : f32 to vector<8x128xf32>
    %117 = arith.mulf %116, %114 : vector<8x128xf32>
    %118 = arith.addf %86, %117 : vector<8x128xf32>
    %c0_49 = arith.constant 0 : index
    %c7 = arith.constant 7 : index
    %119 = memref.load %arg2[%c0_49, %c7] : memref<2x8xf32, #tpu.memory_space<smem>>
    %120 = vector.broadcast %119 : f32 to vector<8x128xf32>
    %121 = arith.mulf %120, %1 : vector<8x128xf32>
    %c1_50 = arith.constant 1 : index
    %c7_51 = arith.constant 7 : index
    %122 = memref.load %arg2[%c1_50, %c7_51] : memref<2x8xf32, #tpu.memory_space<smem>>
    %123 = vector.broadcast %122 : f32 to vector<8x128xf32>
    %124 = arith.mulf %123, %3 : vector<8x128xf32>
    %125 = arith.addf %121, %124 : vector<8x128xf32>
    %c7_52 = arith.constant 7 : index
    %126 = memref.load %arg3[%c7_52] : memref<8xf32, #tpu.memory_space<smem>>
    %127 = vector.broadcast %126 : f32 to vector<8x128xf32>
    %128 = arith.addf %125, %127 : vector<8x128xf32>
    %cst_53 = arith.constant 0.000000e+00 : f32
    %129 = vector.broadcast %cst_53 : f32 to vector<8x128xf32>
    %130 = arith.maximumf %128, %129 : vector<8x128xf32>
    %c7_54 = arith.constant 7 : index
    %131 = memref.load %arg4[%c7_54] : memref<8xf32, #tpu.memory_space<smem>>
    %132 = vector.broadcast %131 : f32 to vector<8x128xf32>
    %133 = arith.mulf %132, %130 : vector<8x128xf32>
    %134 = arith.addf %102, %133 : vector<8x128xf32>
    %135 = arith.addf %118, %134 : vector<8x128xf32>
    %cst_55 = arith.constant 0.000000e+00 : f32
    %136 = vector.broadcast %cst_55 : f32 to vector<8x128xf32>
    %137 = arith.subf %136, %135 : vector<8x128xf32>
    %138 = math.exp %137 : vector<8x128xf32>
    %cst_56 = arith.constant 1.000000e+00 : f32
    %139 = vector.broadcast %cst_56 : f32 to vector<8x128xf32>
    %140 = arith.addf %139, %138 : vector<8x128xf32>
    %141 = tpu.reciprocal %140 : vector<8x128xf32> -> vector<8x128xf32>
    %c0_57 = arith.constant 0 : index
    %c0_58 = arith.constant 0 : index
    %142 = vector.load %arg6[%c0_57, %c0_58] : memref<8x128xf32, #tpu.memory_space<vmem>>, vector<8x128xf32>
    tpu.vector_store %arg6[%c0_57, %c0_58], %141 {strides = array<i32>} : memref<8x128xf32, #tpu.memory_space<vmem>>, vector<8x128xf32>,
    return
  }
  func.func @transform_0(%arg0: i32) -> (i32, i32, i32) {
    %c0_i32 = arith.constant 0 : i32
    %c0_i32_0 = arith.constant 0 : i32
    %c0_i32_1 = arith.constant 0 : i32
    return %c0_i32, %arg0, %c0_i32_0 : i32, i32, i32
  }
  func.func @transform_1(%arg0: i32) -> (i32, i32) {
    %c0_i32 = arith.constant 0 : i32
    %c0_i32_0 = arith.constant 0 : i32
    %c0_i32_1 = arith.constant 0 : i32
    return %c0_i32, %c0_i32_0 : i32, i32
  }
  func.func @transform_2(%arg0: i32) -> i32 {
    %c0_i32 = arith.constant 0 : i32
    %c0_i32_0 = arith.constant 0 : i32
    return %c0_i32 : i32
  }
  func.func @transform_3(%arg0: i32) -> i32 {
    %c0_i32 = arith.constant 0 : i32
    %c0_i32_0 = arith.constant 0 : i32
    return %c0_i32 : i32
  }
  func.func @transform_4(%arg0: i32) -> i32 {
    %c0_i32 = arith.constant 0 : i32
    %c0_i32_0 = arith.constant 0 : i32
    return %c0_i32 : i32
  }
  func.func @transform_5(%arg0: i32) -> (i32, i32) {
    %c0_i32 = arith.constant 0 : i32
    %c0_i32_0 = arith.constant 0 : i32
    return %arg0, %c0_i32 : i32, i32
  }
}

</mosaic_0001>

<bundles_post_ra>
// kernel: tpu_custom_call.1
= control target key start
LH: loop header
LB: loop body
LE: loop exit
PB: predicated region body
PF: predicated region fallthrough
CT: control target
= control target key end

     0   :  { %s1163_s0 = inlined_call_operand.hbm [shape: f32[2,32,128], index: 0, kind: input, shape index: {}]   ;;  %s1164_s1 = inlined_call_operand.vmem [shape: f32[2,8], index: 1, kind: input, shape index: {}]   ;;  %s1165_s2 = inlined_call_operand.vmem [shape: f32[8], index: 2, kind: input, shape index: {}]   ;;  %s1166_s3 = inlined_call_operand.vmem [shape: f32[8], index: 3, kind: input, shape index: {}]   ;;  %s1167_s4 = inlined_call_operand.<no memory space> [shape: f32[1], index: 4, kind: input, shape index: {}]   ;;  %s1168_s5 = inlined_call_operand.hbm [shape: f32[32,128], index: 5, kind: output, shape index: {}]  }
   0x1   :  { %1174 = sst [smem:[#allocation16_spill]] %s1163_s0 }
   0x2   :  { %1175 = sst [smem:[#allocation17_spill]] %s1164_s1 }
   0x3   :  { %1176 = sst [smem:[#allocation18_spill]] %s1165_s2 }
   0x4   :  { %10 = sst [smem:[#allocation2]] %s1167_s4 }
   0x5   :  { %11 = vsyncpa [#allocation4], 0 }
   0x6   :  { %13 = vsyncpa [#allocation4 + $0x1], 0 }
   0x7   :  { %14 = vsyncpa [#allocation6], 0 }
   0x8   :  { %15 = vsyncpa [#allocation9], 0 }
   0x9   :  { %16 = vsyncpa [#allocation5], 0 }
   0xa   :  { %18 = vsyncpa [#allocation5 + $0x1], 0  ;;  %s853_s20 = smov 0   ;;  %s855_s21 = smov 0  }
   0xb   :  { %s857_s22 = smov 0   ;;  %s859_s23 = smov 0  }
   0xc LB: > { %s874_s4 = sadd.s32 4294967295, %s810_s23   ;;  %s529_s24 = sadd.s32 4294967294, %s810_s23   ;;  %s810_s23 = sphi %s859_s23, %s1199_s23   ;;  %s806_s22 = sphi %s857_s22, %s1198_s22   ;;  %s802_s21 = sphi %s855_s21, %s1197_s21   ;;  %s798_s20 = sphi %s853_s20, %s1196_s20  }
   0xd   : > { %s878_s25 = sadd.s32 1, %s810_s23   ;;  %s31_s26 = sadd.s32 1, %s806_s22 }
   0xe   : > { %s28_s27 = ssub.s32 %s810_s23, %s878_s25  ;;  %p38_p0 = scmp.ne.s32.totalorder %s806_s22, %s802_s21 }
   0xf   : > { %p29_p1 = scmp.eq.s32.totalorder %s28_s27, 0  ;;  %p39_p2 = scmp.eq.s32.totalorder %s810_s23, 0 }
  0x10   : > { %p44_p3 = scmp.ne.s32.totalorder %s802_s21, %s798_s20  ;;  %p1169_p4 = scmp.eq.s32.totalorder %s874_s4, 0 }
  0x11   : > { %s890_s28 = scalar_select %p29_p1, %s806_s22, %s31_s26  }
  0x12   : > { %p892_p5 = por %p39_p2, %p38_p0  ;;  %p898_p6 = por %p1169_p4, %p44_p3 }
  0x13   : > { %p152_p7 = scmp.eq.s32.totalorder %s874_s4, 3  ;;  %p158_p8 = scmp.eq.s32.totalorder %s529_s24, 3 }
  0x14   : > { %s1178_s30 = scalar_select %p898_p6, 1, 0 }
  0x15   : > { %p530_p9 = scmp.ge.s32.totalorder %s810_s23, 1  ;;  %p165_p10 = scmp.lt.s32.totalorder %s810_s23, 5 }
  0x16   : > { %p905_p11 = por %p152_p7, %p38_p0  ;;  %p909_p12 = por %p158_p8, %p44_p3 }
  0x17   : > { %p913_p13 = pnand %p530_p9, %p165_p10  ;;  %s1182_s2 = sld [smem:[#allocation18_spill]] }
  0x18   : > { %s1179_s6 = scalar_select %p905_p11, 1, 0 }
  0x19   : > { %s1180_s7 = scalar_select %p909_p12, 1, 0 }
  0x1a   : > { %s1181_s8 = scalar_select %p913_p13, 1, 0 }
  0x1b   : > { %p593_p1 = pneg %p913_p13  ;;  %p614_p0 = scmp.lt.s32.totalorder %s810_s23, 4 }
  0x1c   : > { %s1184_s1 = sld [smem:[#allocation17_spill]] }
  0x1d   : > { %s189_s11 = sshll.u32 %s1182_s2, 4  ;;  %p925_p2 = pnand %p593_p1, %p1169_p4  ;;  %s190_s11 = int_to_ptr.vmem [resolvable:$true] %s189_s11 }
  0x1e   : > { %p934_p3 = pnand %p614_p0, %p892_p5  ;;  %s661_s17 = scalar_lea.vmem %s190_s11, 16 }
  0x1f   : > { %p662_p7 = scmp.ne.s32.totalorder %s190_s11, %s661_s17  ;;  %p663_p8 = pneg %p925_p2 }
  0x20   : > { %s1185_s16 = scalar_select %p934_p3, 1, 0 }
  0x21   : > { %p664_p9 = pnand %p663_p8, %p662_p7  ;;  %p669_p1 = scmp.lt.s32.totalorder %s190_s11, %s190_s11 }
  0x22   : > { %s178_s15 = sshll.u32 %s1184_s1, 4  ;;  %p670_p4 = scmp.lt.s32.totalorder %s661_s17, %s661_s17  ;;  %s179_s15 = int_to_ptr.vmem [resolvable:$true] %s178_s15 }
  0x23   : > { %p665_p10 = pneg %p664_p9 }
  0x24   : > { %p671_p12 = por %p670_p4, %p669_p1 }
  0x26   : > { %p672_p11 = pnand %p671_p12, %p665_p10 }
  0x28   : > { %675 = shalt.err (!%p672_p11)
}
  0x29   : > { %s812_s18 = smov [#allocation8]   ;;  %s200_s26 = sshll.u32 %s1166_s3, 4  ;;  %s201_s26 = int_to_ptr.vmem [resolvable:$true] %s200_s26 }
  0x2a   : > { %599 = dma.vmem_to_smem (!%p925_p2), %s190_s11, 16, %s812_s18, [#allocation9]  }
  0x2b   : > { %s676_s27 = scalar_lea.vmem %s179_s15, 32  ;;  %p684_p9 = scmp.lt.s32.totalorder %s179_s15, %s179_s15 }
  0x2c   : > { %p677_p5 = scmp.ne.s32.totalorder %s179_s15, %s676_s27  ;;  %p685_p6 = scmp.lt.s32.totalorder %s676_s27, %s676_s27 }
  0x2e   : > { %p679_p0 = pnand %p677_p5, %p663_p8  ;;  %p686_p4 = por %p685_p6, %p684_p9 }
  0x30   : > { %p680_p7 = pneg %p679_p0 }
  0x32   : > { %p687_p12 = pnand %p686_p4, %p680_p7 }
  0x34   : > { %690 = shalt.err (!%p687_p12)
}
  0x35   : > { %s813_s29 = smov [#allocation7]   ;;  %s691_s9 = scalar_lea.vmem %s201_s26, 16 }
  0x36   : > { %596 = dma.vmem_to_smem (!%p925_p2), %s179_s15, 32, %s813_s29, [#allocation6]  }
  0x37   : > { %p692_p11 = scmp.ne.s32.totalorder %s201_s26, %s691_s9  ;;  %p699_p13 = scmp.lt.s32.totalorder %s201_s26, %s201_s26 }
  0x38   : > { %p700_p5 = scmp.lt.s32.totalorder %s691_s9, %s691_s9 }
  0x39   : > { %p694_p10 = pnand %p692_p11, %p663_p8 }
  0x3a   : > { %p701_p0 = por %p700_p5, %p699_p13 }
  0x3b   : > { %p695_p1 = pneg %p694_p10 }
  0x3d   : > { %p702_p3 = pnand %p701_p0, %p695_p1 }
  0x3f   : > { %705 = shalt.err (!%p702_p3)
}
  0x40   : > { %s814_s10 = smov [#allocation10]   ;;  %s214_s11 = sand.u32 1, %s806_s22  }
  0x41   : > { %602 = dma.vmem_to_smem (!%p925_p2), %s201_s26, 16, %s814_s10, [#allocation9]  }
  0x42   : > { %s536_s13 = sshll.u32 %s810_s23, 7  ;;  %s535_s14 = sshll.u32 %s214_s11, 4 }
  0x43   : > { %s1186_s0 = sld [smem:[#allocation16_spill]]  ;;  %s218_s19 = scalar_lea.vmem [#allocation3], %s535_s14 }
  0x44   : > { %s224_s24 = sshll.u32 %s218_s19, 4  ;;  %s967_s12 = scalar_lea.sflag [#allocation4], %s214_s11  ;;  %s965_s24 = int_to_ptr.vmem [resolvable:$true] %s224_s24 }
  0x45   : > { %p1187_p13 = scmp.ne.s32.totalorder %s1185_s16, 0 }
  0x47   : > { %p708_p2 = pneg %p1187_p13 }
  0x49   : > { %s963_s18 = scalar_lea.hbm %s1186_s0, %s536_s13  ;;  %s711_s9 = scalar_lea.hbm %s1186_s0, 1024 }
  0x4a   : > { %s706_s27 = scalar_lea.hbm %s963_s18, 256  ;;  %p712_p7 = scmp.lt.u32.totalorder %s963_s18, %s1186_s0 }
  0x4b   : > { %p707_p6 = scmp.ne.s32.totalorder %s963_s18, %s706_s27  ;;  %p713_p9 = scmp.lt.u32.totalorder %s711_s9, %s706_s27 }
  0x4c   : > { %p715_p12 = scmp.lt.u32.totalorder %s706_s27, %s963_s18 }
  0x4d   : > { %p709_p3 = pnand %p708_p2, %p707_p6  ;;  %p714_p4 = por %p713_p9, %p712_p7 }
  0x4f   : > { %p710_p8 = pneg %p709_p3  ;;  %p716_p11 = por %p715_p12, %p714_p4 }
  0x51   : > { %p717_p10 = pnand %p716_p11, %p710_p8 }
  0x53   : > { %720 = shalt.err (!%p717_p10)
}
  0x54   : > { %s721_s11 = scalar_lea.vmem %s965_s24, 256  ;;  %s815_s14 = smov [#allocation3]  }
  0x55   : > { %p722_p1 = scmp.ne.s32.totalorder %s965_s24, %s721_s11  ;;  %s726_s15 = sshll.u32 %s815_s14, 4  ;;  %s727_s15 = int_to_ptr.vmem [resolvable:$false] %s726_s15 }
  0x56   : > { %s728_s17 = scalar_lea.vmem %s727_s15, 512  ;;  %p729_p6 = scmp.lt.s32.totalorder %s965_s24, %s727_s15 }
  0x57   : > { %p724_p5 = pnand %p722_p1, %p708_p2  ;;  %p730_p3 = scmp.lt.s32.totalorder %s728_s17, %s721_s11 }
  0x59   : > { %p725_p0 = pneg %p724_p5  ;;  %p731_p7 = por %p730_p3, %p729_p6 }
  0x5b   : > { %p732_p9 = pnand %p731_p7, %p725_p0 }
  0x5d   : > { %735 = shalt.err (!%p732_p9)
}
  0x5e   : > { %s816_s19 = smov 512   ;;  %s817_s27 = smov 128  }
  0x5f   : > { %s818_s26 = smov 8   ;;  %p1188_p2 = scmp.ne.s32.totalorder %s1181_s8, 0 }
  0x60   : > { %606 = dma.hbm_to_vmem [thread:$0]  (!%p1187_p13), %s963_s18, 256, %s965_s24, %s967_s12, %s816_s19, %s817_s27, %s818_s26  }
  0x61   : > { %236 = sbr.rel (%p1188_p2) target bundleno = 194 (0xc2), region = 40  ;;  %s998_s29 = sand.u32 (!%p1188_p2), 1, %s802_s21  }
  0x62   : > { %s538_s9 = sshll.u32 (!%p1188_p2), %s998_s29, 4  ;;  %s239_s10 = scalar_lea.sflag (!%p1188_p2), [#allocation4], %s998_s29 }
  0x63   : > { %s242_s13 = scalar_lea.vmem (!%p1188_p2), [#allocation3], %s538_s9  ;;  %p1189_p8 = scmp.ne.s32.totalorder (!%p1188_p2), %s1178_s30, 0 }
  0x68   : > { %781 = dma.done.wait (%p1189_p8), %s239_s10, 256  }
  0x69   : > { %783 = vsyncadd (%p1189_p8), %s239_s10, 4294967040  ;;  %p1190_p4 = scmp.eq.s32.totalorder %s874_s4, 0 }
  0x6b   : > { %785 = dma.done.wait (%p1190_p4), [#allocation6], 32   ;;  %p1191_p13 = pmov %p1190_p4 }
  0x6c   : > { %p1192_p12 = pmov %p1190_p4 }
  0x6d   : > { %787 = vsyncadd (%p1191_p13), [#allocation6], 4294967264 }
  0x6e   : > { %789 = dma.done.wait (%p1192_p12), [#allocation9], 32   ;;  %p1193_p11 = pmov %p1190_p4 }
  0x70   : > { %791 = vsyncadd (%p1193_p11), [#allocation9], 4294967264 }
  0x71   : > { %259 = sfence }
  0x72   : > { %s1014_s8 = sld [smem:[#allocation2]]  ;;  %s287_s16 = sld [smem:[#allocation7]]  ;;  %v1022_v0 = vld [vmem:[%s242_s13] sm:$0xff]  ;;  %v1026_v1 = vld [vmem:[%s242_s13 + $0x8] sm:$0xff] }
  0x73   : > { %s544_s18 = sld [smem:[#allocation7 + $0x80]]  ;;  %s545_s12 = sld [smem:[#allocation7 + $0x1]] }
  0x74   : > { %s1016_s24 = sld [smem:[#allocation8]]  ;;  %s546_s11 = sld [smem:[#allocation7 + $0x81]] }
  0x75   : > { %s1018_s30 = sld [smem:[#allocation10]]  ;;  %s1020_s14 = sld [smem:[#allocation8 + $0x1]] }
  0x76   : > { %s1024_s15 = sld [smem:[#allocation10 + $0x1]]  ;;  %s549_s17 = sld [smem:[#allocation7 + $0x2]] }
  0x77   : > { %s1028_s19 = sld [smem:[#allocation7 + $0x82]]  ;;  %s1034_s9 = sld [smem:[#allocation7 + $0x3]] }
  0x78   : > { %s1030_s27 = sld [smem:[#allocation8 + $0x2]]  ;;  %v288_v2 = vstv %s287_s16  ;;  %s1037_s10 = sld [smem:[#allocation7 + $0x83]]  ;;  %v286_v13 = vstv %s1014_s8 }
  0x79   : > { %s1032_s26 = sld [smem:[#allocation10 + $0x2]]  ;;  %v289_v3 = vmul.f32 %v288_v2, %v1022_v0  ;;  %v291_v4 = vstv %s544_s18  ;;  %s1039_s0 = sld [smem:[#allocation8 + $0x3]]  ;;  %v303_v6 = vstv %s545_s12 }
  0x7a   : > { %v292_v5 = vmul.f32 %v1026_v1, %v291_v4  ;;  %s1042_s13 = sld [smem:[#allocation10 + $0x3]]  ;;  %s1044_s16 = sld [smem:[#allocation7 + $0x4]]  ;;  %v295_v7 = vstv %s1016_s24  ;;  %v304_v8 = vmul.f32 %v303_v6, %v1022_v0  ;;  %v306_v9 = vstv %s546_s11 }
  0x7b   : > { %s1048_s18 = sld [smem:[#allocation7 + $0x84]]  ;;  %v307_v11 = vmul.f32 %v1026_v1, %v306_v9  ;;  %s1055_s2 = sld [smem:[#allocation7 + $0x5]]  ;;  %v310_v14 = vstv %s1020_s14  ;;  %v299_v18 = vstv %s1018_s30 }
  0x7c   : > { %s1050_s1 = sld [smem:[#allocation8 + $0x4]]  ;;  %v293_v10 = vadd.f32 %v292_v5, %v289_v3  ;;  %v318_v12 = vstv %s549_s17  ;;  %s1061_s24 = sld [smem:[#allocation7 + $0x85]]  ;;  %v314_v21 = vstv %s1024_s15 }
  0x7d   : > { %s1053_s12 = sld [smem:[#allocation10 + $0x4]]  ;;  %v319_v15 = vmul.f32 %v318_v12, %v1022_v0  ;;  %v321_v16 = vstv %s1028_s19  ;;  %v308_v19 = vadd.f32 %v307_v11, %v304_v8  ;;  %s1065_s11 = sld [smem:[#allocation8 + $0x5]]  ;;  %v333_v23 = vstv %s1034_s9 }
  0x7e   : > { %v296_v17 = vadd.f32 %v295_v7, %v293_v10  ;;  %v322_v20 = vmul.f32 %v1026_v1, %v321_v16  ;;  %v325_v22 = vstv %s1030_s27  ;;  %v336_v24 = vstv %s1037_s10  ;;  %s1071_s8 = sld [smem:[#allocation7 + $0x6]]  ;;  %s1080_s30 = sld [smem:[#allocation10 + $0x5]] }
  0x7f   : > { %s1073_s14 = sld [smem:[#allocation7 + $0x86]]  ;;  %v311_v26 = vadd.f32 %v310_v14, %v308_v19  ;;  %v334_v28 = vmul.f32 %v333_v23, %v1022_v0  ;;  %v329_v29 = vstv %s1032_s26  ;;  %v337_v30 = vmul.f32 %v1026_v1, %v336_v24  ;;  %s1086_s17 = sld [smem:[#allocation7 + $0x7]] }
  0x80   : > { %v297_v25 = vmax.f32 %v296_v17, 0.0  ;;  %v323_v27 = vadd.f32 %v322_v20, %v319_v15  ;;  %v348_v31 = vstv %s1044_s16  ;;  %s1082_s15 = sld [smem:[#allocation8 + $0x6]]  ;;  %v340_v35 = vstv %s1039_s0  ;;  %s1088_s19 = sld [smem:[#allocation7 + $0x87]] }
  0x81   : > { %v351_v32 = vstv %s1048_s18  ;;  %v349_v36 = vmul.f32 %v348_v31, %v1022_v0  ;;  %v312_v37 = vmax.f32 %v311_v26, 0.0  ;;  %v338_v38 = vadd.f32 %v337_v30, %v334_v28  ;;  %s1095_s0 = sld [smem:[#allocation8 + $0x7]]  ;;  %s1099_s27 = sld [smem:[#allocation10 + $0x6]] }
  0x82   : > { %v300_v33 = vmul.f32 %v299_v18, %v297_v25  ;;  %v326_v34 = vadd.f32 %v325_v22, %v323_v27  ;;  %v344_v39 = vstv %s1042_s13  ;;  %v352_v40 = vmul.f32 %v1026_v1, %v351_v32  ;;  %s574_s26 = sshll.u32 %s874_s4, 7  ;;  %p1194_p1 = scmp.ne.s32.totalorder %s1179_s6, 0 }
  0x83   : > { %v355_v42 = vstv %s1050_s1  ;;  %v359_v43 = vstv %s1053_s12  ;;  %v363_v44 = vstv %s1055_s2  ;;  %v341_v45 = vadd.f32 %v340_v35, %v338_v38  ;;  %s572_s1 = sld [smem:[#allocation10 + $0x7]]  ;;  %s542_s2 = sshll.u32 %s998_s29, 3 }
  0x84   : > { %v327_v41 = vmax.f32 %v326_v34, 0.0  ;;  %v353_v46 = vadd.f32 %v352_v40, %v349_v36  ;;  %v364_v47 = vmul.f32 %v363_v44, %v1022_v0  ;;  %v366_v48 = vstv %s1061_s24  ;;  %s281_s9 = scalar_lea.vmem [#allocation11], %s542_s2  ;;  %s1120_s18 = scalar_lea.hbm %s1168_s5, %s574_s26 }
  0x85   : > { %v301_v49 = vadd.f32 %v300_v33, %v286_v13  ;;  %v367_v51 = vmul.f32 %v1026_v1, %v366_v48  ;;  %v370_v52 = vstv %s1065_s11  ;;  %v342_v53 = vmax.f32 %v341_v45, 0.0  ;;  %s428_s10 = sshll.u32 %s281_s9, 4  ;;  %s415_s12 = scalar_lea.sflag [#allocation5], %s998_s29  ;;  %s1122_s10 = int_to_ptr.vmem [resolvable:$true] %s428_s10 }
  0x86   : > { %v330_v50 = vmul.f32 %v329_v29, %v327_v41  ;;  %v356_v54 = vadd.f32 %v355_v42, %v353_v46  ;;  %v378_v55 = vstv %s1071_s8  ;;  %v381_v56 = vstv %s1073_s14  ;;  %s736_s24 = scalar_lea.vmem %s1122_s10, 128  ;;  %s819_s4 = smov [#allocation11]  }
  0x87   : > { %v315_v57 = vmul.f32 %v314_v21, %v312_v37  ;;  %v368_v58 = vadd.f32 %v367_v51, %v364_v47  ;;  %v379_v59 = vmul.f32 %v378_v55, %v1022_v0  ;;  %v382_v60 = vmul.f32 %v1026_v1, %v381_v56  ;;  %p737_p10 = scmp.ne.s32.totalorder %s1122_s10, %s736_s24  ;;  %s740_s11 = sshll.u32 %s819_s4, 4  ;;  %s741_s11 = int_to_ptr.vmem [resolvable:$false] %s740_s11 }
  0x88   : > { %v345_v61 = vmul.f32 %v344_v39, %v342_v53  ;;  %v357_v62 = vmax.f32 %v356_v54, 0.0  ;;  %v374_v63 = vstv %s1080_s30  ;;  %v385_v2 = vstv %s1082_s15  ;;  %s742_s8 = scalar_lea.vmem %s741_s11, 256  ;;  %p743_p6 = scmp.lt.s32.totalorder %s1122_s10, %s741_s11 }
  0x89   : > { %v371_v3 = vadd.f32 %v370_v52, %v368_v58  ;;  %v383_v4 = vadd.f32 %v382_v60, %v379_v59  ;;  %v393_v5 = vstv %s1086_s17  ;;  %v396_v6 = vstv %s1088_s19  ;;  %p738_p5 = pnand %p737_p10, %p1194_p1  ;;  %p744_p3 = scmp.lt.s32.totalorder %s742_s8, %s736_s24 }
  0x8a   : > { %v331_v7 = vadd.f32 %v330_v50, %v301_v49  ;;  %v360_v8 = vmul.f32 %v359_v43, %v357_v62  ;;  %v394_v9 = vmul.f32 %v393_v5, %v1022_v0  ;;  %v397_v10 = vmul.f32 %v1026_v1, %v396_v6 }
  0x8b   : > { %v372_v11 = vmax.f32 %v371_v3, 0.0  ;;  %v386_v12 = vadd.f32 %v385_v2, %v383_v4  ;;  %v400_v13 = vstv %s1095_s0  ;;  %v346_v14 = vadd.f32 %v345_v61, %v315_v57  ;;  %p739_p0 = pneg %p738_p5  ;;  %p745_p7 = por %p744_p3, %p743_p6 }
  0x8c   : > { %v389_v15 = vstv %s1099_s27  ;;  %v398_v16 = vadd.f32 %v397_v10, %v394_v9  ;;  %v361_v19 = vadd.f32 %v360_v8, %v331_v7  ;;  %v404_v22 = vstv %s572_s1 }
  0x8d   : > { %v375_v17 = vmul.f32 %v374_v63, %v372_v11  ;;  %v387_v18 = vmax.f32 %v386_v12, 0.0  ;;  %p746_p9 = pnand %p745_p7, %p739_p0 }
  0x8e   : > { %v401_v20 = vadd.f32 %v400_v13, %v398_v16 }
  0x8f   : > { %v390_v21 = vmul.f32 %v389_v15, %v387_v18  ;;  %v376_v23 = vadd.f32 %v375_v17, %v346_v14 }
  0x90   : > { %v402_v24 = vmax.f32 %v401_v20, 0.0 }
  0x91   : > { %v391_v25 = vadd.f32 %v390_v21, %v361_v19 }
  0x92   : > { %v405_v0 = vmul.f32 %v404_v22, %v402_v24 }
  0x94   : > { %v406_v26 = vadd.f32 %v405_v0, %v376_v23 }
  0x96   : > { %v407_v1 = vadd.f32 %v406_v26, %v391_v25 }
  0x98   : > { %v408_v27 = vsub.f32 0.0, %v407_v1 }
  0x9a   : > { %v409_v28 = vmul.f32 1.442695, %v408_v27 }
  0x9c   : > { %657 = vpow2.f32 %v409_v28 }
  0xa6   : > { %v658_v29 = vpop.eup %657 }
  0xa7   : > { %v411_v30 = vadd.f32 1.0, %v658_v29 }
  0xa9   : > { %659 = vrcp.f32 %v411_v30 }
  0xb3   : > { %v660_v31 = vpop.eup %659 }
  0xb4   : > { %413 = vst [vmem:[%s281_s9] sm:$0xff] %v660_v31 }
  0xb5   : > { %749 = shalt.err (!%p746_p9)
}
  0xb6   : > { %s750_s29 = scalar_lea.hbm %s1120_s18, 128  ;;  %s754_s15 = scalar_lea.hbm %s1168_s5, 512 }
  0xb7   : > { %p751_p2 = scmp.ne.s32.totalorder %s1120_s18, %s750_s29  ;;  %p755_p13 = scmp.lt.u32.totalorder %s1120_s18, %s1168_s5 }
  0xb8   : > { %p756_p12 = scmp.lt.u32.totalorder %s754_s15, %s750_s29  ;;  %p758_p10 = scmp.lt.u32.totalorder %s750_s29, %s1120_s18 }
  0xb9   : > { %p752_p8 = pnand %p751_p2, %p1194_p1 }
  0xba   : > { %p757_p11 = por %p756_p12, %p755_p13 }
  0xbb   : > { %p753_p4 = pneg %p752_p8 }
  0xbc   : > { %p759_p5 = por %p758_p10, %p757_p11 }
  0xbe   : > { %p760_p0 = pnand %p759_p5, %p753_p4 }
  0xc0   : > { %763 = shalt.err (!%p760_p0)
}
  0xc1   : > { %591 = dma.vmem_to_hbm [thread:$0]  (%p1194_p1), %s1122_s10, 128, %s1120_s18, %s415_s12  }
  0xc2 PF: > { %p618_p6 = scmp.ge.s32.totalorder %s810_s23, 2  ;;  %s440_s0 = sand.u32 1, %s798_s20  }
  0xc3   : > { %p1195_p3 = scmp.ne.s32.totalorder %s1180_s7, 0  ;;  %s441_s27 = scalar_lea.sflag [#allocation5], %s440_s0 }
  0xc5   : > { %p608_p7 = pnand %p618_p6, %p1195_p3 }
  0xc7   : > { %793 = dma.done.wait (!%p608_p7), %s441_s27, 128  }
  0xc8   : > { %795 = vsyncadd (!%p608_p7), %s441_s27, 4294967168  ;;  %p21_p9 = scmp.ge.s32.totalorder %s878_s25, 6   ;;  %s1196_s20 = smov %s802_s21 }
  0xc9   : > { %s1197_s21 = smov %s806_s22  ;;  %s1198_s22 = smov %s890_s28 }
  0xca   : > { %s1199_s23 = smov %s878_s25  ;;  %23 = sbr.rel (!%p21_p9) target bundleno = 12 (0xc), region = 99 }
  0xd1   :  { %446 = vsyncpa [#allocation4], 1 }
  0xd2   :  { %448 = vsyncpa [#allocation4 + $0x1], 1 }
  0xd3   :  { %449 = vsyncpa [#allocation5], 1 }
  0xd4   :  { %451 = vsyncpa [#allocation5 + $0x1], 1 }
  0xd5   :  { %452 = vsyncpa [#allocation6], 1 }
  0xd6   :  { %454 = vsyncpa [#allocation6 + $0x1], 1 }
  0xd7   :  { %455 = vsyncpa [#allocation9], 1 }

</bundles_post_ra>
